<compile_context>
chip_gen: v5e
topology: v5e:2x2
jax: 0.10.0
libtpu: 0.0.40
codegen_flags: <defaults>
</compile_context>

<pallas_src>
import functools

import jax
import jax.numpy as jnp
from jax.experimental import pallas as pl
from jax.experimental.pallas import tpu as pltpu


def _round_up(x, m):
    return (x + m - 1) // m * m


def _trend_kernel(z_ref, w1_ref, b1_ref, w2pm_ref, b2pm_ref, out_ref):
    # dense1 + relu:  (TB, L) @ (L, FPp) -> (TB, FPp), f32 accumulation.
    h = jnp.dot(z_ref[...], w1_ref[...], preferred_element_type=jnp.float32)
    h = jnp.maximum(h + b1_ref[...], 0.0)
    # Fused dense2 + poly-basis contraction + permute:
    # (TB, FPp) @ (FPp, SFp) -> (TB, SFp), lane-dense output.
    out = jnp.dot(h.astype(w2pm_ref.dtype), w2pm_ref[...],
                  preferred_element_type=jnp.float32)
    out_ref[...] = (out + b2pm_ref[...]).astype(out_ref.dtype)


@functools.partial(
    jax.jit,
    static_argnames=("seq_len", "feat_dim", "trend_poly", "compute_dtype"),
)
def trend_layer_forward(z, w1, b1, w2, b2, *, seq_len, feat_dim, trend_poly,
                        compute_dtype=jnp.float32):
    """z: (B, latent_dim) -> (B, seq_len, feat_dim), matching the PyTorch module."""
    B, latent_dim = z.shape
    FP = feat_dim * trend_poly
    SF = seq_len * feat_dim

    # --- polynomial basis + fold (plain JAX glue, fused/folded under jit) ----
    lin_space = jnp.arange(0, float(seq_len), 1.0, dtype=jnp.float32) / seq_len  # (S,)
    poly_space = jnp.stack(
        [lin_space ** float(p + 1) for p in range(trend_poly)], axis=0
    )  # (P, S)
    # poly_mat[f*P + p, s*F + g] = poly_space[p, s] * delta(f, g)
    poly_mat = jnp.einsum(
        "ps,fg->fpsg", poly_space, jnp.eye(feat_dim, dtype=jnp.float32)
    ).reshape(FP, SF)

    # Fold dense2 + poly contraction + permute into a single resident matrix.
    w2pm = w2 @ poly_mat      # (FP, SF)
    b2pm = b2 @ poly_mat      # (1, SF)

    # --- (8, 128)-aligned padding --------------------------------------------
    TB = min(512, _round_up(B, 8))          # batch rows per grid step
    B_pad = _round_up(B, TB)
    FP_pad = _round_up(FP, 128)
    SF_pad = _round_up(SF, 128)

    z_p = jnp.pad(z, ((0, B_pad - B), (0, 0))).astype(compute_dtype)
    w1_p = jnp.pad(w1, ((0, 0), (0, FP_pad - FP))).astype(compute_dtype)
    b1_p = jnp.pad(b1, ((0, 0), (0, FP_pad - FP)))                      # stays f32
    w2pm_p = jnp.pad(w2pm, ((0, FP_pad - FP), (0, SF_pad - SF))).astype(compute_dtype)
    b2pm_p = jnp.pad(b2pm, ((0, 0), (0, SF_pad - SF)))                  # stays f32

    n_blocks = B_pad // TB

    # Conservative VMEM budget (assume everything double-buffered).
    itemsize = jnp.dtype(compute_dtype).itemsize
    vmem_bytes = 2 * (
        TB * latent_dim * itemsize          # z block
        + TB * SF_pad * 4                   # out block (f32)
        + latent_dim * FP_pad * itemsize    # w1 (resident)
        + FP_pad * 4                        # b1
        + FP_pad * SF_pad * itemsize        # w2pm (resident)
        + SF_pad * 4                        # b2pm
    )
    cp_kwargs = dict(dimension_semantics=("parallel",))
    if vmem_bytes > 12 * 1024 * 1024:
        cp_kwargs["vmem_limit_bytes"] = int(min(vmem_bytes + (4 << 20), 64 << 20))

    out_flat = pl.pallas_call(
        _trend_kernel,
        out_shape=jax.ShapeDtypeStruct((B_pad, SF_pad), jnp.float32),
        grid=(n_blocks,),
        in_specs=[
            pl.BlockSpec((TB, latent_dim), lambda i: (i, 0)),   # z: pipelined
            pl.BlockSpec((latent_dim, FP_pad), lambda i: (0, 0)),  # w1: resident
            pl.BlockSpec((1, FP_pad), lambda i: (0, 0)),           # b1: resident
            pl.BlockSpec((FP_pad, SF_pad), lambda i: (0, 0)),      # w2pm: resident
            pl.BlockSpec((1, SF_pad), lambda i: (0, 0)),           # b2pm: resident
        ],
        out_specs=pl.BlockSpec((TB, SF_pad), lambda i: (i, 0)),
        compiler_params=pltpu.CompilerParams(**cp_kwargs),
    )(z_p, w1_p, b1_p, w2pm_p, b2pm_p)

    # Strip padding and restore the (B, S, F) layout of the PyTorch module.
    return out_flat[:B, :SF].reshape(B, seq_len, feat_dim)


def init_params(key, latent_dim, feat_dim, trend_poly):
    """Deterministic Linear-layer init (torch-style uniform, but synthetic)."""
    FP = feat_dim * trend_poly
    k1, k2, k3, k4 = jax.random.split(key, 4)
    bound1 = 1.0 / jnp.sqrt(latent_dim)
    bound2 = 1.0 / jnp.sqrt(FP)
    # Stored already transposed for x @ W form.
    w1 = jax.random.uniform(k1, (latent_dim, FP), jnp.float32, -bound1, bound1)
    b1 = jax.random.uniform(k2, (1, FP), jnp.float32, -bound1, bound1)
    w2 = jax.random.uniform(k3, (FP, FP), jnp.float32, -bound2, bound2)
    b2 = jax.random.uniform(k4, (1, FP), jnp.float32, -bound2, bound2)
    return w1, b1, w2, b2


def reference_forward(z, w1, b1, w2, b2, seq_len, feat_dim, trend_poly):
    """Pure-JAX reference mirroring the PyTorch module for verification."""
    h = jax.nn.relu(z @ w1 + b1[0])
    tp = (h @ w2 + b2[0]).reshape(-1, feat_dim, trend_poly)
    lin_space = jnp.arange(0, float(seq_len), 1.0, dtype=jnp.float32) / seq_len
    poly_space = jnp.stack(
        [lin_space ** float(p + 1) for p in range(trend_poly)], axis=0
    )
    trend_vals = jnp.einsum("bfp,ps->bfs", tp, poly_space)
    return jnp.transpose(trend_vals, (0, 2, 1))


if __name__ == "__main__":
    # Small shapes consistent with the module.
    B, seq_len, feat_dim, latent_dim, trend_poly = 2, 8, 4, 32, 2

    key = jax.random.PRNGKey(0)
    kz, kp = jax.random.split(key)
    z = jax.random.normal(kz, (B, latent_dim), dtype=jnp.float32)
    w1, b1, w2, b2 = init_params(kp, latent_dim, feat_dim, trend_poly)

    ref = reference_forward(z, w1, b1, w2, b2, seq_len, feat_dim, trend_poly)

    # f32 operands (default).
    out = trend_layer_forward(z, w1, b1, w2, b2, seq_len=seq_len,
                              feat_dim=feat_dim, trend_poly=trend_poly)
    out = jax.block_until_ready(out)
    assert out.shape == (B, seq_len, feat_dim)
    assert jnp.allclose(out, ref, atol=1e-4, rtol=1e-3), "f32 mismatch vs reference"

    # bf16 operands + f32 accumulation: the v6e/v7x bandwidth-friendly mode.
    out_bf16 = trend_layer_forward(z, w1, b1, w2, b2, seq_len=seq_len,
                                   feat_dim=feat_dim, trend_poly=trend_poly,
                                   compute_dtype=jnp.bfloat16)
    out_bf16 = jax.block_until_ready(out_bf16)
    assert jnp.allclose(out_bf16, ref, atol=5e-2, rtol=5e-2), "bf16 mismatch vs reference"

    print("KERNEL_OK")
</pallas_src>

<mosaic_0001>
module attributes {stable_mosaic.version = 11 : i64} {
  func.func @_trend_kernel(%arg0: i32, %arg1: memref<8x32xf32, #tpu.memory_space<vmem>>, %arg2: memref<32x128xf32, #tpu.memory_space<vmem>>, %arg3: memref<1x128xf32, #tpu.memory_space<vmem>>, %arg4: memref<128x128xf32, #tpu.memory_space<vmem>>, %arg5: memref<1x128xf32, #tpu.memory_space<vmem>>, %arg6: memref<8x128xf32, #tpu.memory_space<vmem>>) attributes {dimension_semantics = [#tpu.dimension_semantics<parallel>], iteration_bounds = array<i64: 1>, scalar_prefetch = 0 : i64, scratch_operands = 0 : i64, tpu.core_type = #tpu.core_type<tc>, window_params = [{transform_indices = @transform_0, window_bounds = array<i64: 8, 32>}, {pipeline_mode = #tpu.pipeline_mode<synchronous>, transform_indices = @transform_1, window_bounds = array<i64: 32, 128>}, {pipeline_mode = #tpu.pipeline_mode<synchronous>, transform_indices = @transform_2, window_bounds = array<i64: 1, 128>}, {pipeline_mode = #tpu.pipeline_mode<synchronous>, transform_indices = @transform_3, window_bounds = array<i64: 128, 128>}, {pipeline_mode = #tpu.pipeline_mode<synchronous>, transform_indices = @transform_4, window_bounds = array<i64: 1, 128>}, {transform_indices = @transform_5, window_bounds = array<i64: 8, 128>}]} {
    %c0 = arith.constant 0 : index
    %c0_0 = arith.constant 0 : index
    %0 = vector.load %arg1[%c0, %c0_0] : memref<8x32xf32, #tpu.memory_space<vmem>>, vector<8x32xf32>
    %c0_1 = arith.constant 0 : index
    %c0_2 = arith.constant 0 : index
    %1 = vector.load %arg2[%c0_1, %c0_2] : memref<32x128xf32, #tpu.memory_space<vmem>>, vector<32x128xf32>
    %cst = arith.constant dense<0.000000e+00> : vector<8x128xf32>
    %2 = tpu.matmul %0, %1, %cst {dimension_numbers = #tpu.dot_dimension_numbers<[1], [0], [0], [1], [0, 0, 1, 1], [], []>} : vector<8x32xf32>, vector<32x128xf32>, vector<8x128xf32> -> vector<8x128xf32>
    %c0_3 = arith.constant 0 : index
    %c0_4 = arith.constant 0 : index
    %3 = vector.load %arg3[%c0_3, %c0_4] : memref<1x128xf32, #tpu.memory_space<vmem>>, vector<1x128xf32>
    %4 = vector.broadcast %3 : vector<1x128xf32> to vector<8x128xf32>
    %5 = arith.addf %2, %4 : vector<8x128xf32>
    %cst_5 = arith.constant 0.000000e+00 : f32
    %6 = vector.broadcast %cst_5 : f32 to vector<8x128xf32>
    %7 = arith.maximumf %5, %6 : vector<8x128xf32>
    %c0_6 = arith.constant 0 : index
    %c0_7 = arith.constant 0 : index
    %8 = vector.load %arg4[%c0_6, %c0_7] : memref<128x128xf32, #tpu.memory_space<vmem>>, vector<128x128xf32>
    %cst_8 = arith.constant dense<0.000000e+00> : vector<8x128xf32>
    %9 = tpu.matmul %7, %8, %cst_8 {dimension_numbers = #tpu.dot_dimension_numbers<[1], [0], [0], [1], [0, 0, 1, 1], [], []>} : vector<8x128xf32>, vector<128x128xf32>, vector<8x128xf32> -> vector<8x128xf32>
    %c0_9 = arith.constant 0 : index
    %c0_10 = arith.constant 0 : index
    %10 = vector.load %arg5[%c0_9, %c0_10] : memref<1x128xf32, #tpu.memory_space<vmem>>, vector<1x128xf32>
    %11 = vector.broadcast %10 : vector<1x128xf32> to vector<8x128xf32>
    %12 = arith.addf %9, %11 : vector<8x128xf32>
    %c0_11 = arith.constant 0 : index
    %c0_12 = arith.constant 0 : index
    %13 = vector.load %arg6[%c0_11, %c0_12] : memref<8x128xf32, #tpu.memory_space<vmem>>, vector<8x128xf32>
    tpu.vector_store %arg6[%c0_11, %c0_12], %12 {strides = array<i32>} : memref<8x128xf32, #tpu.memory_space<vmem>>, vector<8x128xf32>,
    return
  }
  func.func @transform_0(%arg0: i32) -> (i32, i32) {
    %c0_i32 = arith.constant 0 : i32
    %c0_i32_0 = arith.constant 0 : i32
    return %arg0, %c0_i32 : i32, i32
  }
  func.func @transform_1(%arg0: i32) -> (i32, i32) {
    %c0_i32 = arith.constant 0 : i32
    %c0_i32_0 = arith.constant 0 : i32
    %c0_i32_1 = arith.constant 0 : i32
    return %c0_i32, %c0_i32_0 : i32, i32
  }
  func.func @transform_2(%arg0: i32) -> (i32, i32) {
    %c0_i32 = arith.constant 0 : i32
    %c0_i32_0 = arith.constant 0 : i32
    %c0_i32_1 = arith.constant 0 : i32
    return %c0_i32, %c0_i32_0 : i32, i32
  }
  func.func @transform_3(%arg0: i32) -> (i32, i32) {
    %c0_i32 = arith.constant 0 : i32
    %c0_i32_0 = arith.constant 0 : i32
    %c0_i32_1 = arith.constant 0 : i32
    return %c0_i32, %c0_i32_0 : i32, i32
  }
  func.func @transform_4(%arg0: i32) -> (i32, i32) {
    %c0_i32 = arith.constant 0 : i32
    %c0_i32_0 = arith.constant 0 : i32
    %c0_i32_1 = arith.constant 0 : i32
    return %c0_i32, %c0_i32_0 : i32, i32
  }
  func.func @transform_5(%arg0: i32) -> (i32, i32) {
    %c0_i32 = arith.constant 0 : i32
    %c0_i32_0 = arith.constant 0 : i32
    return %arg0, %c0_i32 : i32, i32
  }
}

</mosaic_0001>

<bundles_post_ra>
// kernel: trend_layer_forward.1
= control target key start
LH: loop header
LB: loop body
LE: loop exit
PB: predicated region body
PF: predicated region fallthrough
CT: control target
= control target key end

     0   :  { %vm29_vm0 = vcmask 261120   ;;  %s204_s1 = inlined_call_operand.vmem [shape: f32[32,128], index: 1, kind: input, shape index: {}]   ;;  %s205_s3 = inlined_call_operand.vmem [shape: f32[128,128], index: 3, kind: input, shape index: {}]   ;;  %s206_s0 = inlined_call_operand.vmem [shape: f32[8,32], index: 0, kind: input, shape index: {}]   ;;  %s207_s2 = inlined_call_operand.vmem [shape: f32[1,128], index: 2, kind: input, shape index: {}]   ;;  %s208_s4 = inlined_call_operand.vmem [shape: f32[1,128], index: 4, kind: input, shape index: {}]   ;;  %s209_s5 = inlined_call_operand.vmem [shape: f32[8,128], index: 5, kind: output, shape index: {}]  }
   0x1   :  { %v24_v0 = vld [vmem:[%s204_s1 + $0x18] sm:$0xff]  ;;  %v23_v1 = vld [vmem:[%s204_s1 + $0x10] sm:$0xff]  ;;  %v22_v3 = vld [vmem:[%s204_s1 + $0x8] sm:$0xff] }
   0x2   :  { %45 = vmatpush.msra.mxu0 %v24_v0  ;;  %v69_v2 = vld [vmem:[%s205_s3 + $0x78] sm:$0xff]  ;;  %v68_v4 = vld [vmem:[%s205_s3 + $0x70] sm:$0xff]  ;;  %v67_v5 = vld [vmem:[%s205_s3 + $0x68] sm:$0xff] }
   0x3   :  { %74 = vmatpush.msra.mxu1 %v69_v2  ;;  %v21_v6 = vld [vmem:[%s204_s1] sm:$0xff]  ;;  %v65_v9 = vld [vmem:[%s205_s3 + $0x58] sm:$0xff]  ;;  %v64_v10 = vld [vmem:[%s205_s3 + $0x50] sm:$0xff] }
   0x4   :  { %46 = vmatpush.msra.mxu0 %v23_v1  ;;  %v20_v7 = vld [vmem:[%s206_s0] sm:$0xff]  ;;  %v63_v11 = vld [vmem:[%s205_s3 + $0x48] sm:$0xff]  ;;  %v61_v13 = vld [vmem:[%s205_s3 + $0x38] sm:$0xff] }
   0x5   :  { %75 = vmatpush.msra.mxu1 %v68_v4  ;;  %v66_v8 = vld [vmem:[%s205_s3 + $0x60] sm:$0xff]  ;;  %v60_v14 = vld [vmem:[%s205_s3 + $0x30] sm:$0xff]  ;;  %v59_v15 = vld [vmem:[%s205_s3 + $0x28] sm:$0xff] }
   0x6   :  { %47 = vmatpush.msra.mxu0 %v22_v3  ;;  %v62_v12 = vld [vmem:[%s205_s3 + $0x40] sm:$0xff]  ;;  %v57_v17 = vld [vmem:[%s205_s3 + $0x18] sm:$0xff]  ;;  %v56_v18 = vld [vmem:[%s205_s3 + $0x10] sm:$0xff] }
   0x7   :  { %76 = vmatpush.msra.mxu1 %v67_v5  ;;  %v58_v16 = vld [vmem:[%s205_s3 + $0x20] sm:$0xff]  ;;  %v55_v19 = vld [vmem:[%s205_s3 + $0x8] sm:$0xff] }
   0x8   :  { %48 = vmatpush.msra.mxu0 %v21_v6  ;;  %v54_v20 = vld [vmem:[%s205_s3] sm:$0xff] }
   0x9   :  { %99 = vmatmul.msk.f32.vlgmr.msra.gmra.mxu0 %vm29_vm0, %v20_v7  ;;  %77 = vmatpush.msra.mxu1 %v66_v8  ;;  %v100_v21 = vld [vmem:[%s207_s2] ss:$0 sm:$0xff] }
   0xa   :  { %v101_v25 = vld [vmem:[%s208_s4] ss:$0 sm:$0xff] }
   0xb   :  { %78 = vmatpush.msra.mxu1 %v65_v9 }
   0xd   :  { %79 = vmatpush.msra.mxu1 %v64_v10 }
   0xf   :  { %80 = vmatpush.msra.mxu1 %v63_v11 }
  0x11   :  { %81 = vmatpush.msra.mxu1 %v62_v12 }
  0x13   :  { %82 = vmatpush.msra.mxu1 %v61_v13 }
  0x15   :  { %83 = vmatpush.msra.mxu1 %v60_v14 }
  0x17   :  { %84 = vmatpush.msra.mxu1 %v59_v15 }
  0x19   :  { %85 = vmatpush.msra.mxu1 %v58_v16 }
  0x1b   :  { %86 = vmatpush.msra.mxu1 %v57_v17 }
  0x1d   :  { %87 = vmatpush.msra.mxu1 %v56_v18 }
  0x1f   :  { %88 = vmatpush.msra.mxu1 %v55_v19 }
  0x21   :  { %89 = vmatpush.msra.mxu1 %v54_v20 }
  0x86   :  { %v50_v22 = vpop.f32.mrf.mxu0 }
  0x87   :  { %v51_v23 = vadd.f32 %v100_v21, %v50_v22 }
  0x89   :  { %v53_v24 = vmax.f32 %v51_v23, 0.0 }
  0x8b   :  { %90 = vmatmul.f32.vlgmr.msra.gmra.mxu1 %v53_v24 }
 0x108   :  { %v91_v26 = vpop.f32.mrf.mxu1 }
 0x109   :  { %v92_v27 = vadd.f32 %v101_v25, %v91_v26 }
 0x10b   :  { %94 = vst [vmem:[%s209_s5] sm:$0xff] %v92_v27 }

</bundles_post_ra>
